<compile_context>
chip_gen: v5e
topology: v5e:2x2
jax: 0.10.0
libtpu: 0.0.40
codegen_flags: <defaults>
</compile_context>

<pallas_src>
import jax
import jax.numpy as jnp
from jax.experimental import pallas as pl
from jax.experimental.pallas import tpu as pltpu

MNIST_IMAGE_SIZE = 28 * 28       # 784 (contraction dim of layer 1)
HIDDEN = 128
NUM_CLASSES = 10
TB_MAX = 1024                    # max batch-tile rows: near HBM roofline, and the
                                 # f32 x tile (~3.7 MB) double-buffered still fits
                                 # v5e's 16 MiB scoped-VMEM default.


def _round_up(x, m):
    return (x + m - 1) // m * m


def _cdiv(a, b):
    return -(-a // b)


def _choose_tiling(B):
    """Pick (tile_rows, padded_batch).

    - rows aligned to 16 (covers f32 sublane granule and bf16 packing granule)
    - tile capped at TB_MAX
    - for batches >= 256 the tile count is forced even (>= 2) so the
      batch-parallel grid splits across both v7x TensorCores; v5e/v6e are
      unaffected (tiles stay >= 128 rows, near the measured mem-bound roofline).
    """
    b_aligned = _round_up(B, 16)
    if b_aligned < 256:
        n_tiles = 1
    else:
        n_tiles = _cdiv(b_aligned, TB_MAX)
        if n_tiles % 2:
            n_tiles += 1
    tb = _round_up(_cdiv(b_aligned, n_tiles), 16)
    return tb, tb * n_tiles


def _resident_spec(block_shape):
    """BlockSpec for a grid-invariant (VMEM-resident) operand.

    Constant index_map -> the pipeline only fetches it once; when the installed
    JAX supports it, pl.Buffered(1) also drops the useless second buffer.
    """
    index_map = lambda i: (0,) * len(block_shape)
    if hasattr(pl, "Buffered"):
        try:
            return pl.BlockSpec(block_shape, index_map,
                                pipeline_mode=pl.Buffered(1))
        except TypeError:
            pass  # older BlockSpec signature without pipeline_mode
    return pl.BlockSpec(block_shape, index_map)


def mlp_kernel(x_ref, w1_ref, b1_ref, w2_ref, b2_ref, o_ref):
    # Cast the streamed f32 x tile to bf16 in VMEM (VPU), then layer 1 on the
    # MXU with f32 accumulation: (tb, 784)bf16 @ (784, 128)bf16 -> (tb, 128)f32.
    x = x_ref[...].astype(jnp.bfloat16)
    h = jnp.dot(x, w1_ref[...], preferred_element_type=jnp.float32)
    h = jnp.maximum(h + b1_ref[...], 0.0)                 # bias + ReLU (VPU)
    # Layer 2: (tb, 128)bf16 @ (128, 10)bf16 -> (tb, 10)f32.
    out = jnp.dot(h.astype(jnp.bfloat16), w2_ref[...],
                  preferred_element_type=jnp.float32)
    o_ref[...] = (out + b2_ref[...]).astype(o_ref.dtype)


@jax.jit
def mlp_forward(x, w1, b1, w2, b2):
    """x: (B, 1, 28, 28) float32 (NCHW). Returns logits (B, 10) float32."""
    B = x.shape[0]
    x_flat = x.reshape(B, -1)                              # Flatten: (B, 784) f32

    tb, b_pad = _choose_tiling(B)
    n_tiles = b_pad // tb

    # Pad ONLY the batch dim, and only when B is not already a tile multiple.
    if b_pad != B:
        x_flat = jnp.pad(x_flat, ((0, b_pad - B), (0, 0)))

    # One-time tiny weight casts (stay VMEM-resident inside the kernel).
    w1_b = w1.astype(jnp.bfloat16)                         # (784, 128)
    b1_f = b1.reshape(1, HIDDEN).astype(jnp.float32)       # (1, 128)
    w2_b = w2.astype(jnp.bfloat16)                         # (128, 10)
    b2_f = b2.reshape(1, NUM_CLASSES).astype(jnp.float32)  # (1, 10)

    cost = pl.CostEstimate(
        flops=2 * b_pad * (MNIST_IMAGE_SIZE * HIDDEN + HIDDEN * NUM_CLASSES),
        transcendentals=0,
        bytes_accessed=(b_pad * MNIST_IMAGE_SIZE * 4        # x (f32, streamed)
                        + MNIST_IMAGE_SIZE * HIDDEN * 2     # W1 (bf16)
                        + HIDDEN * NUM_CLASSES * 2          # W2 (bf16)
                        + (HIDDEN + NUM_CLASSES) * 4        # biases (f32)
                        + b_pad * NUM_CLASSES * 4),         # logits (f32, narrow)
    )

    out = pl.pallas_call(
        mlp_kernel,
        out_shape=jax.ShapeDtypeStruct((b_pad, NUM_CLASSES), jnp.float32),
        grid=(n_tiles,),
        in_specs=[
            pl.BlockSpec((tb, MNIST_IMAGE_SIZE), lambda i: (i, 0)),  # x (pipelined)
            _resident_spec((MNIST_IMAGE_SIZE, HIDDEN)),              # W1
            _resident_spec((1, HIDDEN)),                             # b1
            _resident_spec((HIDDEN, NUM_CLASSES)),                   # W2
            _resident_spec((1, NUM_CLASSES)),                        # b2
        ],
        out_specs=pl.BlockSpec((tb, NUM_CLASSES), lambda i: (i, 0)),
        compiler_params=pltpu.CompilerParams(
            dimension_semantics=("parallel",)),            # batch across v7x TCs
        cost_estimate=cost,
    )(x_flat, w1_b, b1_f, w2_b, b2_f)

    return out[:B] if b_pad != B else out


def init_params(key):
    """Deterministic init mimicking nn.Linear default (uniform +-1/sqrt(fan_in))."""
    k1, k2, k3, k4 = jax.random.split(key, 4)
    bound1 = 1.0 / (MNIST_IMAGE_SIZE ** 0.5)
    bound2 = 1.0 / (HIDDEN ** 0.5)
    # Stored as (in, out) so the kernel computes x @ W (PyTorch stores (out, in)).
    w1 = jax.random.uniform(k1, (MNIST_IMAGE_SIZE, HIDDEN), jnp.float32,
                            -bound1, bound1)
    b1 = jax.random.uniform(k2, (HIDDEN,), jnp.float32, -bound1, bound1)
    w2 = jax.random.uniform(k3, (HIDDEN, NUM_CLASSES), jnp.float32,
                            -bound2, bound2)
    b2 = jax.random.uniform(k4, (NUM_CLASSES,), jnp.float32, -bound2, bound2)
    return w1, b1, w2, b2


if __name__ == "__main__":
    key = jax.random.PRNGKey(0)
    kx, kp = jax.random.split(key)

    B = 8
    x = jax.random.normal(kx, (B, 1, 28, 28), dtype=jnp.float32)
    w1, b1, w2, b2 = init_params(kp)

    logits = mlp_forward(x, w1, b1, w2, b2)
    jax.block_until_ready(logits)

    # Reference in plain JAX using the same bf16-inputs / f32-accumulate recipe.
    x_flat = x.reshape(B, -1)
    h_ref = jnp.maximum(
        jnp.dot(x_flat.astype(jnp.bfloat16), w1.astype(jnp.bfloat16),
                preferred_element_type=jnp.float32) + b1, 0.0)
    ref = jnp.dot(h_ref.astype(jnp.bfloat16), w2.astype(jnp.bfloat16),
                  preferred_element_type=jnp.float32) + b2

    assert logits.shape == (B, NUM_CLASSES)
    assert jnp.allclose(logits, ref, atol=2e-2, rtol=2e-2), \
        float(jnp.max(jnp.abs(logits - ref)))

    print("KERNEL_OK")
</pallas_src>

<mosaic_0001>
module attributes {stable_mosaic.version = 11 : i64} {
  func.func @mlp_kernel(%arg0: i32, %arg1: memref<16x784xf32, #tpu.memory_space<vmem>>, %arg2: memref<784x128xbf16, #tpu.memory_space<vmem>>, %arg3: memref<1x128xf32, #tpu.memory_space<vmem>>, %arg4: memref<128x10xbf16, #tpu.memory_space<vmem>>, %arg5: memref<1x10xf32, #tpu.memory_space<vmem>>, %arg6: memref<16x10xf32, #tpu.memory_space<vmem>>) attributes {dimension_semantics = [#tpu.dimension_semantics<parallel>], iteration_bounds = array<i64: 1>, scalar_prefetch = 0 : i64, scratch_operands = 0 : i64, tpu.core_type = #tpu.core_type<tc>, window_params = [{transform_indices = @transform_0, window_bounds = array<i64: 16, 784>}, {pipeline_mode = #tpu.pipeline_mode<synchronous>, transform_indices = @transform_1, window_bounds = array<i64: 784, 128>}, {pipeline_mode = #tpu.pipeline_mode<synchronous>, transform_indices = @transform_2, window_bounds = array<i64: 1, 128>}, {pipeline_mode = #tpu.pipeline_mode<synchronous>, transform_indices = @transform_3, window_bounds = array<i64: 128, 10>}, {pipeline_mode = #tpu.pipeline_mode<synchronous>, transform_indices = @transform_4, window_bounds = array<i64: 1, 10>}, {transform_indices = @transform_5, window_bounds = array<i64: 16, 10>}]} {
    %c0 = arith.constant 0 : index
    %c0_0 = arith.constant 0 : index
    %0 = vector.load %arg1[%c0, %c0_0] : memref<16x784xf32, #tpu.memory_space<vmem>>, vector<16x784xf32>
    %1 = arith.truncf %0 : vector<16x784xf32> to vector<16x784xbf16>
    %c0_1 = arith.constant 0 : index
    %c0_2 = arith.constant 0 : index
    %2 = vector.load %arg2[%c0_1, %c0_2] : memref<784x128xbf16, #tpu.memory_space<vmem>>, vector<784x128xbf16>
    %cst = arith.constant dense<0.000000e+00> : vector<16x128xf32>
    %3 = tpu.matmul %1, %2, %cst {dimension_numbers = #tpu.dot_dimension_numbers<[1], [0], [0], [1], [0, 0, 1, 1], [], []>} : vector<16x784xbf16>, vector<784x128xbf16>, vector<16x128xf32> -> vector<16x128xf32>
    %c0_3 = arith.constant 0 : index
    %c0_4 = arith.constant 0 : index
    %4 = vector.load %arg3[%c0_3, %c0_4] : memref<1x128xf32, #tpu.memory_space<vmem>>, vector<1x128xf32>
    %5 = vector.broadcast %4 : vector<1x128xf32> to vector<16x128xf32>
    %6 = arith.addf %3, %5 : vector<16x128xf32>
    %cst_5 = arith.constant 0.000000e+00 : f32
    %7 = vector.broadcast %cst_5 : f32 to vector<16x128xf32>
    %8 = arith.maximumf %6, %7 : vector<16x128xf32>
    %9 = arith.truncf %8 : vector<16x128xf32> to vector<16x128xbf16>
    %c0_6 = arith.constant 0 : index
    %c0_7 = arith.constant 0 : index
    %10 = vector.load %arg4[%c0_6, %c0_7] : memref<128x10xbf16, #tpu.memory_space<vmem>>, vector<128x10xbf16>
    %cst_8 = arith.constant dense<0.000000e+00> : vector<16x10xf32>
    %11 = tpu.matmul %9, %10, %cst_8 {dimension_numbers = #tpu.dot_dimension_numbers<[1], [0], [0], [1], [0, 0, 1, 1], [], []>} : vector<16x128xbf16>, vector<128x10xbf16>, vector<16x10xf32> -> vector<16x10xf32>
    %c0_9 = arith.constant 0 : index
    %c0_10 = arith.constant 0 : index
    %12 = vector.load %arg5[%c0_9, %c0_10] : memref<1x10xf32, #tpu.memory_space<vmem>>, vector<1x10xf32>
    %13 = vector.broadcast %12 : vector<1x10xf32> to vector<16x10xf32>
    %14 = arith.addf %11, %13 : vector<16x10xf32>
    %c0_11 = arith.constant 0 : index
    %c0_12 = arith.constant 0 : index
    %15 = vector.load %arg6[%c0_11, %c0_12] : memref<16x10xf32, #tpu.memory_space<vmem>>, vector<16x10xf32>
    tpu.vector_store %arg6[%c0_11, %c0_12], %14 {strides = array<i32>} : memref<16x10xf32, #tpu.memory_space<vmem>>, vector<16x10xf32>,
    return
  }
  func.func @transform_0(%arg0: i32) -> (i32, i32) {
    %c0_i32 = arith.constant 0 : i32
    %c0_i32_0 = arith.constant 0 : i32
    return %arg0, %c0_i32 : i32, i32
  }
  func.func @transform_1(%arg0: i32) -> (i32, i32) {
    %c0_i32 = arith.constant 0 : i32
    %c0_i32_0 = arith.constant 0 : i32
    %c0_i32_1 = arith.constant 0 : i32
    return %c0_i32, %c0_i32_0 : i32, i32
  }
  func.func @transform_2(%arg0: i32) -> (i32, i32) {
    %c0_i32 = arith.constant 0 : i32
    %c0_i32_0 = arith.constant 0 : i32
    %c0_i32_1 = arith.constant 0 : i32
    return %c0_i32, %c0_i32_0 : i32, i32
  }
  func.func @transform_3(%arg0: i32) -> (i32, i32) {
    %c0_i32 = arith.constant 0 : i32
    %c0_i32_0 = arith.constant 0 : i32
    %c0_i32_1 = arith.constant 0 : i32
    return %c0_i32, %c0_i32_0 : i32, i32
  }
  func.func @transform_4(%arg0: i32) -> (i32, i32) {
    %c0_i32 = arith.constant 0 : i32
    %c0_i32_0 = arith.constant 0 : i32
    %c0_i32_1 = arith.constant 0 : i32
    return %c0_i32, %c0_i32_0 : i32, i32
  }
  func.func @transform_5(%arg0: i32) -> (i32, i32) {
    %c0_i32 = arith.constant 0 : i32
    %c0_i32_0 = arith.constant 0 : i32
    return %arg0, %c0_i32 : i32, i32
  }
}

</mosaic_0001>

<bundles_post_ra>
// kernel: mlp_forward.1
= control target key start
LH: loop header
LB: loop body
LE: loop exit
PB: predicated region body
PF: predicated region fallthrough
CT: control target
= control target key end

     0   :  { %vm438_vm0 = vcmask 130048   ;;  %vm625_vm1 = vcmask 80896   ;;  %s1175_s1 = inlined_call_operand.vmem [shape: bf16[784,128], index: 1, kind: input, shape index: {}]   ;;  %s1176_s2 = inlined_call_operand.vmem [shape: f32[1,128], index: 2, kind: input, shape index: {}]   ;;  %s1177_s0 = inlined_call_operand.vmem [shape: f32[16,784], index: 0, kind: input, shape index: {}]   ;;  %s1178_s4 = inlined_call_operand.vmem [shape: f32[1,10], index: 4, kind: input, shape index: {}]   ;;  %s1179_s3 = inlined_call_operand.vmem [shape: bf16[128,10], index: 3, kind: input, shape index: {}]   ;;  %s1180_s5 = inlined_call_operand.vmem [shape: f32[16,10], index: 5, kind: output, shape index: {}]  }
   0x1   :  { %v868_v0 = vld [vmem:[%s1175_s1 + $0x38] sm:$0xff]  ;;  %v867_v4 = vld [vmem:[%s1175_s1 + $0x30] sm:$0xff]  ;;  %v866_v8 = vld [vmem:[%s1175_s1 + $0x28] sm:$0xff] }
   0x2   :  { %v876_v1 = vld [vmem:[%s1175_s1 + $0x78] sm:$0xff]  ;;  %442 = vmatpush.bf16.msra.mxu0 %v868_v0  ;;  %v875_v5 = vld [vmem:[%s1175_s1 + $0x70] sm:$0xff]  ;;  %v874_v9 = vld [vmem:[%s1175_s1 + $0x68] sm:$0xff] }
   0x3   :  { %v884_v2 = vld [vmem:[%s1175_s1 + $0xb8] sm:$0xff]  ;;  %456 = vmatpush.bf16.msra.mxu1 %v876_v1  ;;  %v883_v6 = vld [vmem:[%s1175_s1 + $0xb0] sm:$0xff]  ;;  %v882_v10 = vld [vmem:[%s1175_s1 + $0xa8] sm:$0xff] }
   0x4   :  { %v892_v3 = vld [vmem:[%s1175_s1 + $0xf8] sm:$0xff]  ;;  %470 = vmatpush.bf16.msra.mxu2 %v884_v2  ;;  %v891_v7 = vld [vmem:[%s1175_s1 + $0xf0] sm:$0xff]  ;;  %v890_v11 = vld [vmem:[%s1175_s1 + $0xe8] sm:$0xff] }
   0x5   :  { %484 = vmatpush.bf16.msra.mxu3 %v892_v3  ;;  %v865_v12 = vld [vmem:[%s1175_s1 + $0x20] sm:$0xff]  ;;  %v864_v16 = vld [vmem:[%s1175_s1 + $0x18] sm:$0xff]  ;;  %v863_v20 = vld [vmem:[%s1175_s1 + $0x10] sm:$0xff] }
   0x6   :  { %443 = vmatpush.bf16.msra.mxu0 %v867_v4  ;;  %v873_v13 = vld [vmem:[%s1175_s1 + $0x60] sm:$0xff]  ;;  %v872_v17 = vld [vmem:[%s1175_s1 + $0x58] sm:$0xff]  ;;  %v871_v21 = vld [vmem:[%s1175_s1 + $0x50] sm:$0xff] }
   0x7   :  { %457 = vmatpush.bf16.msra.mxu1 %v875_v5  ;;  %v881_v14 = vld [vmem:[%s1175_s1 + $0xa0] sm:$0xff]  ;;  %v880_v18 = vld [vmem:[%s1175_s1 + $0x98] sm:$0xff]  ;;  %v879_v22 = vld [vmem:[%s1175_s1 + $0x90] sm:$0xff] }
   0x8   :  { %471 = vmatpush.bf16.msra.mxu2 %v883_v6  ;;  %v889_v15 = vld [vmem:[%s1175_s1 + $0xe0] sm:$0xff]  ;;  %v888_v19 = vld [vmem:[%s1175_s1 + $0xd8] sm:$0xff]  ;;  %v887_v23 = vld [vmem:[%s1175_s1 + $0xd0] sm:$0xff] }
   0x9   :  { %485 = vmatpush.bf16.msra.mxu3 %v891_v7  ;;  %v862_v24 = vld [vmem:[%s1175_s1 + $0x8] sm:$0xff]  ;;  %v861_v28 = vld [vmem:[%s1175_s1] sm:$0xff]  ;;  %v28_v31 = vld [vmem:[%s1177_s0 + $0x38] sm:$0xff] }
   0xa   :  { %444 = vmatpush.bf16.msra.mxu0 %v866_v8  ;;  %v870_v25 = vld [vmem:[%s1175_s1 + $0x48] sm:$0xff]  ;;  %v869_v29 = vld [vmem:[%s1175_s1 + $0x40] sm:$0xff]  ;;  %v900_v34 = vld [vmem:[%s1175_s1 + $0x138] sm:$0xff] }
   0xb   :  { %458 = vmatpush.bf16.msra.mxu1 %v874_v9  ;;  %v878_v26 = vld [vmem:[%s1175_s1 + $0x88] sm:$0xff]  ;;  %v21_v30 = vld [vmem:[%s1177_s0] sm:$0xff]  ;;  %v908_v35 = vld [vmem:[%s1175_s1 + $0x178] sm:$0xff] }
   0xc   :  { %472 = vmatpush.bf16.msra.mxu2 %v882_v10  ;;  %v886_v27 = vld [vmem:[%s1175_s1 + $0xc8] sm:$0xff]  ;;  %v29_v33 = vld [vmem:[%s1177_s0 + $0x40] sm:$0xff]  ;;  %v23_v38 = vld [vmem:[%s1177_s0 + $0x10] sm:$0xff]  ;;  %v35_v40 = vpack.c.bf16 %v28_v31, %v21_v30 }
   0xd   :  { %486 = vmatpush.bf16.msra.mxu3 %v890_v11  ;;  %v22_v32 = vld [vmem:[%s1177_s0 + $0x8] sm:$0xff]  ;;  %v877_v36 = vld [vmem:[%s1175_s1 + $0x80] sm:$0xff]  ;;  %v24_v41 = vld [vmem:[%s1177_s0 + $0x18] sm:$0xff] }
   0xe   :  { %445 = vmatpush.bf16.msra.mxu0 %v865_v12  ;;  %v885_v37 = vld [vmem:[%s1175_s1 + $0xc0] sm:$0xff]  ;;  %v30_v39 = vld [vmem:[%s1177_s0 + $0x48] sm:$0xff]  ;;  %v31_v42 = vld [vmem:[%s1177_s0 + $0x50] sm:$0xff]  ;;  %v36_v43 = vpack.c.bf16 %v29_v33, %v22_v32 }
   0xf   :  { %459 = vmatpush.bf16.msra.mxu1 %v873_v13  ;;  %v909_v44 = vld [vmem:[%s1175_s1 + $0x180] sm:$0xff]  ;;  %v899_v45 = vld [vmem:[%s1175_s1 + $0x130] sm:$0xff]  ;;  %v37_v47 = vpack.c.bf16 %v30_v39, %v23_v38  ;;  %v38_v48 = vpack.c.bf16 %v31_v42, %v24_v41  ;;  %v898_v49 = vld [vmem:[%s1175_s1 + $0x128] sm:$0xff] }
  0x10   :  { %473 = vmatpush.bf16.msra.mxu2 %v881_v14  ;;  %v907_v46 = vld [vmem:[%s1175_s1 + $0x170] sm:$0xff]  ;;  %v906_v50 = vld [vmem:[%s1175_s1 + $0x168] sm:$0xff]  ;;  %v897_v51 = vld [vmem:[%s1175_s1 + $0x120] sm:$0xff] }
  0x11   :  { %487 = vmatpush.bf16.msra.mxu3 %v889_v15  ;;  %v905_v52 = vld [vmem:[%s1175_s1 + $0x160] sm:$0xff]  ;;  %v896_v53 = vld [vmem:[%s1175_s1 + $0x118] sm:$0xff]  ;;  %v27_v55 = vld [vmem:[%s1177_s0 + $0x30] sm:$0xff] }
  0x12   :  { %446 = vmatpush.bf16.msra.mxu0 %v864_v16  ;;  %v904_v54 = vld [vmem:[%s1175_s1 + $0x158] sm:$0xff]  ;;  %v34_v56 = vld [vmem:[%s1177_s0 + $0x68] sm:$0xff]  ;;  %v895_v57 = vld [vmem:[%s1175_s1 + $0x110] sm:$0xff] }
  0x13   :  { %460 = vmatpush.bf16.msra.mxu1 %v872_v17  ;;  %v903_v58 = vld [vmem:[%s1175_s1 + $0x150] sm:$0xff]  ;;  %v41_v59 = vpack.c.bf16 %v34_v56, %v27_v55  ;;  %v894_v60 = vld [vmem:[%s1175_s1 + $0x108] sm:$0xff]  ;;  %v893_v62 = vld [vmem:[%s1175_s1 + $0x100] sm:$0xff] }
  0x14   :  { %474 = vmatpush.bf16.msra.mxu2 %v880_v18  ;;  %v902_v61 = vld [vmem:[%s1175_s1 + $0x148] sm:$0xff]  ;;  %v901_v63 = vld [vmem:[%s1175_s1 + $0x140] sm:$0xff]  ;;  %v32_v1 = vld [vmem:[%s1177_s0 + $0x58] sm:$0xff] }
  0x15   :  { %488 = vmatpush.bf16.msra.mxu3 %v888_v19  ;;  %v25_v0 = vld [vmem:[%s1177_s0 + $0x20] sm:$0xff]  ;;  %v26_v2 = vld [vmem:[%s1177_s0 + $0x28] sm:$0xff]  ;;  %v917_v6 = vld [vmem:[%s1179_s3 + $0x38] sm:$0xff] }
  0x16   :  { %447 = vmatpush.bf16.msra.mxu0 %v863_v20  ;;  %v33_v3 = vld [vmem:[%s1177_s0 + $0x60] sm:$0xff]  ;;  %v39_v4 = vpack.c.bf16 %v32_v1, %v25_v0  ;;  %v916_v7 = vld [vmem:[%s1179_s3 + $0x30] sm:$0xff]  ;;  %v915_v8 = vld [vmem:[%s1179_s3 + $0x28] sm:$0xff] }
  0x17   :  { %461 = vmatpush.bf16.msra.mxu1 %v871_v21  ;;  %v40_v5 = vpack.c.bf16 %v33_v3, %v26_v2  ;;  %v914_v9 = vld [vmem:[%s1179_s3 + $0x20] sm:$0xff]  ;;  %v913_v10 = vld [vmem:[%s1179_s3 + $0x18] sm:$0xff]  ;;  %v912_v11 = vld [vmem:[%s1179_s3 + $0x10] sm:$0xff] }
  0x18   :  { %475 = vmatpush.bf16.msra.mxu2 %v879_v22  ;;  %v911_v12 = vld [vmem:[%s1179_s3 + $0x8] sm:$0xff]  ;;  %v910_v16 = vld [vmem:[%s1179_s3] sm:$0xff] }
  0x19   :  { %489 = vmatpush.bf16.msra.mxu3 %v887_v23  ;;  %v918_v17 = vld [vmem:[%s1176_s2] ss:$0 sm:$0xff] }
  0x1a   :  { %448 = vmatpush.bf16.msra.mxu0 %v862_v24 }
  0x1b   :  { %462 = vmatpush.bf16.msra.mxu1 %v870_v25 }
  0x1c   :  { %476 = vmatpush.bf16.msra.mxu2 %v878_v26 }
  0x1d   :  { %490 = vmatpush.bf16.msra.mxu3 %v886_v27 }
  0x1e   :  { %449 = vmatpush.bf16.msra.mxu0 %v861_v28 }
  0x1f   :  { %463 = vmatpush.bf16.msra.mxu1 %v869_v29 }
  0x20   :  { %477 = vmatpush.bf16.msra.mxu2 %v877_v36 }
  0x21   :  { %491 = vmatpush.bf16.msra.mxu3 %v885_v37  ;;  %450 = vmatmul.bf16.vlgmr.msra.gmra.mxu0 %v35_v40 }
  0x22   :  { %498 = vmatpush.bf16.msrb.mxu0 %v900_v34  ;;  %464 = vmatmul.bf16.vlgmr.msra.gmra.mxu1 %v36_v43 }
  0x23   :  { %512 = vmatpush.bf16.msrb.mxu1 %v908_v35  ;;  %478 = vmatmul.bf16.vlgmr.msra.gmra.mxu2 %v37_v47 }
  0x24   :  { %533 = vmatpush.bf16.msrb.mxu2 %v909_v44  ;;  %492 = vmatmul.bf16.vlgmr.msra.gmra.mxu3 %v38_v48 }
  0x25   :  { %611 = vmatpush.bf16.msrb.mxu3 %v917_v6 }
  0x26   :  { %499 = vmatpush.bf16.msrb.mxu0 %v899_v45 }
  0x27   :  { %513 = vmatpush.bf16.msrb.mxu1 %v907_v46  ;;  %v919_v46 = vld [vmem:[%s1178_s4] ss:$0 sm:$0xff] }
  0x29   :  { %612 = vmatpush.bf16.msrb.mxu3 %v916_v7 }
  0x2a   :  { %500 = vmatpush.bf16.msrb.mxu0 %v898_v49 }
  0x2b   :  { %514 = vmatpush.bf16.msrb.mxu1 %v906_v50 }
  0x2d   :  { %613 = vmatpush.bf16.msrb.mxu3 %v915_v8 }
  0x2e   :  { %501 = vmatpush.bf16.msrb.mxu0 %v897_v51 }
  0x2f   :  { %515 = vmatpush.bf16.msrb.mxu1 %v905_v52 }
  0x31   :  { %614 = vmatpush.bf16.msrb.mxu3 %v914_v9 }
  0x32   :  { %502 = vmatpush.bf16.msrb.mxu0 %v896_v53 }
  0x33   :  { %516 = vmatpush.bf16.msrb.mxu1 %v904_v54  ;;  %828 = vmatmul.msk.bf16.vlgmr.msrb.gmra.mxu2 %vm438_vm0, %v41_v59 }
  0x35   :  { %615 = vmatpush.bf16.msrb.mxu3 %v913_v10 }
  0x36   :  { %503 = vmatpush.bf16.msrb.mxu0 %v895_v57 }
  0x37   :  { %517 = vmatpush.bf16.msrb.mxu1 %v903_v58 }
  0x39   :  { %616 = vmatpush.bf16.msrb.mxu3 %v912_v11 }
  0x3a   :  { %504 = vmatpush.bf16.msrb.mxu0 %v894_v60 }
  0x3b   :  { %518 = vmatpush.bf16.msrb.mxu1 %v902_v61 }
  0x3d   :  { %617 = vmatpush.bf16.msrb.mxu3 %v911_v12 }
  0x3e   :  { %505 = vmatpush.bf16.msrb.mxu0 %v893_v62 }
  0x3f   :  { %519 = vmatpush.bf16.msrb.mxu1 %v901_v63 }
  0x41   :  { %506 = vmatmul.bf16.vlgmr.msrb.gmra.mxu0 %v39_v4  ;;  %618 = vmatpush.bf16.msrb.mxu3 %v910_v16 }
  0x42   :  { %520 = vmatmul.bf16.vlgmr.msrb.gmra.mxu1 %v40_v5 }
  0x9e   :  { %v451_v13 = vpop.f32.mrf.mxu0 }
  0x9f   :  { %v465_v14 = vpop.f32.mrf.mxu1  ;;  %v452_v18 = vadd.f32 %v918_v17, %v451_v13 }
  0xa1   :  { %v466_v22 = vadd.f32 %v465_v14, %v452_v18 }
  0xa6   :  { %v479_v15 = vpop.f32.mrf.mxu2  ;;  %v453_v19 = vpop.f32.mrf.mxu0 }
  0xa7   :  { %v467_v20 = vpop.f32.mrf.mxu1  ;;  %v493_v23 = vpop.f32.mrf.mxu3  ;;  %v454_v24 = vadd.f32 %v918_v17, %v453_v19  ;;  %v480_v25 = vadd.f32 %v479_v15, %v466_v22 }
  0xa9   :  { %v468_v26 = vadd.f32 %v467_v20, %v454_v24  ;;  %v494_v29 = vadd.f32 %v493_v23, %v480_v25 }
  0xae   :  { %v481_v21 = vpop.f32.mrf.mxu2 }
  0xaf   :  { %v482_v31 = vadd.f32 %v481_v21, %v468_v26  ;;  %v495_v33 = vpop.f32.mrf.mxu3 }
  0xb1   :  { %v496_v34 = vadd.f32 %v495_v33, %v482_v31 }
  0xb6   :  { %v535_v30 = vpop.f32.mrf.mxu2 }
  0xbe   :  { %v507_v27 = vpop.f32.mrf.mxu0  ;;  %v537_v41 = vpop.f32.mrf.mxu2 }
  0xbf   :  { %v521_v28 = vpop.f32.mrf.mxu1  ;;  %v508_v32 = vadd.f32 %v507_v27, %v494_v29 }
  0xc1   :  { %v522_v35 = vadd.f32 %v521_v28, %v508_v32 }
  0xc3   :  { %v536_v39 = vadd.f32 %v535_v30, %v522_v35 }
  0xc5   :  { %v540_v43 = vmax.f32 %v536_v39, 0.0 }
  0xc6   :  { %v509_v36 = vpop.f32.mrf.mxu0 }
  0xc7   :  { %v510_v37 = vadd.f32 %v509_v36, %v496_v34  ;;  %v523_v38 = vpop.f32.mrf.mxu1 }
  0xc9   :  { %v524_v40 = vadd.f32 %v523_v38, %v510_v37 }
  0xcb   :  { %v538_v42 = vadd.f32 %v537_v41, %v524_v40 }
  0xcd   :  { %v541_v44 = vmax.f32 %v538_v42, 0.0 }
  0xcf   :  { %v542_v45 = vpack.c.bf16 %v541_v44, %v540_v43 }
  0xd1   :  { %619 = vmatmul.bf16.vlgmr.msrb.gmra.mxu3 %v542_v45 }
 0x154   :  { %v620_v47 = vpop.f32.mrf.mxu3 }
 0x155   :  { %v621_v48 = vadd.f32 %v919_v46, %v620_v47 }
 0x157   :  { %626 = vst.msk [vmem:[%s1180_s5] sm:$0xff] %vm625_vm1, %v621_v48 }
 0x15c   :  { %v622_v49 = vpop.f32.mrf.mxu3 }
 0x15d   :  { %v623_v50 = vadd.f32 %v919_v46, %v622_v49 }
 0x15f   :  { %627 = vst.msk [vmem:[%s1180_s5 + $0x8] sm:$0xff] %vm625_vm1, %v623_v50 }

</bundles_post_ra>
